<compile_context>
chip_gen: v6e
topology: v6e:2x2x1
jax: 0.10.0
libtpu: 0.0.40
codegen_flags: <defaults>
</compile_context>

<pallas_src>
import jax
import jax.numpy as jnp
from jax.experimental import pallas as pl
from jax.experimental.pallas import tpu as pltpu


_CompilerParams = getattr(pltpu, "CompilerParams", None) or getattr(
    pltpu, "TPUCompilerParams", None)


def zmodel_kernel(b2_sm, xn_ref, w1t_ref, bw_ref, noise_ref, out_ref):
    """One batch tile: Linear1 (MXU) + tanh + noise + Linear2(->1) + ReLU."""
    # Layer 1: BN affine already fused into xn (bf16).  bf16 MXU, f32 acc.
    h = jnp.dot(w1t_ref[...], xn_ref[...],
                preferred_element_type=jnp.float32)          # (hidden, TB) f32
    bw = bw_ref[...]                                         # (hidden, 2) f32
    y = jnp.tanh(h + bw[:, 0:1])                             # + b1, tanh (EUP)
    # Gaussian noise (already scaled by 2 in the wrapper), bf16 -> f32 add.
    y = y + noise_ref[...].astype(jnp.float32)
    # Layer 2 (out_features == 1): VPU multiply + sublane (XLU) reduction.
    z = jnp.sum(y * bw[:, 1:2], axis=0, keepdims=True) + b2_sm[0]   # (1, TB)
    out_ref[...] = jnp.maximum(z, 0.0)                       # ReLU, lane-dense


def _pick_tile_and_pad(batch, in_size, hidden, tiling_budget_bytes=20 * 2**20):
    """Largest multiple-of-128 lane tile that fits the VMEM budget."""
    b128 = -(-batch // 128) * 128
    # Per-batch-column cost: double-buffered streams (x^T bf16, noise bf16,
    # out f32) + f32 intermediates (h, y, y*w2).
    per_col = 2 * (in_size * 2 + hidden * 2 + 4) + 3 * hidden * 4
    const_bytes = hidden * in_size * 2 + hidden * 2 * 4 + (1 << 14)
    avail = max(tiling_budget_bytes - const_bytes, per_col * 128)
    tile = max(128, min((avail // per_col) // 128 * 128, 4096))
    tile = min(tile, b128)
    # Keep >= 2 grid steps when the batch allows it (v7x dual-TC sharding).
    if b128 >= 256:
        tile = min(tile, max(128, (b128 // 2) // 128 * 128))
    padded = -(-batch // tile) * tile
    return tile, padded


def zmodel_forward(x, gamma, beta, w1, b1, w2, b2, seed=0):
    """Zmodel forward.

    x:(B, in) f32, gamma/beta:(in,), w1:(in, hidden) (= Linear1.weight.T),
    b1:(hidden,), w2:(hidden,) (= Linear2.weight row), b2:(1,). Returns (B,).
    """
    x = x.astype(jnp.float32)
    B, in_size = x.shape
    hidden = w1.shape[1]

    # ---- BatchNorm1d (training-mode batch stats, eps=1e-5, biased variance)
    # fused with its affine in one XLA pass over the full (un-padded) batch.
    mean = jnp.mean(x, axis=0)
    var = jnp.var(x, axis=0)
    inv = jax.lax.rsqrt(var + 1e-5)
    scale = gamma.reshape(-1) * inv
    shift = beta.reshape(-1) - mean * scale
    xn = x * scale[None, :] + shift[None, :]                 # (B, in) f32

    # ---- layout plumbing: batch on the lane axis, bf16 streams, padded batch
    tile_b, Bp = _pick_tile_and_pad(B, in_size, hidden)
    grid = (Bp // tile_b,)
    xn_t = xn.T.astype(jnp.bfloat16)                         # (in, B) bf16
    if Bp != B:
        xn_t = jnp.pad(xn_t, ((0, 0), (0, Bp - B)))

    w1t = jnp.asarray(w1).T.astype(jnp.bfloat16)             # (hidden, in) bf16
    bw = jnp.stack([jnp.asarray(b1, jnp.float32).reshape(-1),
                    jnp.asarray(w2, jnp.float32).reshape(-1)], axis=1)  # (hid,2)
    b2_sm = jnp.asarray(b2, jnp.float32).reshape(1)          # SMEM scalar

    # Gaussian noise (randn * 2), pre-scaled and bf16 to halve its HBM stream.
    noise2 = (jax.random.normal(jax.random.PRNGKey(seed), (hidden, Bp),
                                jnp.float32) * 2.0).astype(jnp.bfloat16)

    # ---- explicit VMEM limit (~25% headroom) so the chosen tile is not
    # silently blocked by per-generation scoped-VMEM defaults.
    stream = 2 * (in_size * tile_b * 2 + hidden * tile_b * 2 + tile_b * 4)
    scratch = 3 * hidden * tile_b * 4
    const = 2 * (hidden * in_size * 2 + hidden * 2 * 4)
    vmem_limit = int(min(max((stream + scratch + const) * 1.25, 16 * 2**20),
                         48 * 2**20))

    def call(single_buffer_consts):
        const_kw = {}
        if single_buffer_consts and hasattr(pl, "Buffered"):
            const_kw["pipeline_mode"] = pl.Buffered(1)
        in_specs = [
            pl.BlockSpec((in_size, tile_b), lambda i, b2r: (0, i)),   # x_n^T
            pl.BlockSpec((hidden, in_size), lambda i, b2r: (0, 0), **const_kw),
            pl.BlockSpec((hidden, 2), lambda i, b2r: (0, 0), **const_kw),
            pl.BlockSpec((hidden, tile_b), lambda i, b2r: (0, i)),    # noise
        ]
        extra = {}
        if _CompilerParams is not None:
            extra["compiler_params"] = _CompilerParams(
                dimension_semantics=("parallel",),
                vmem_limit_bytes=vmem_limit)
        return pl.pallas_call(
            zmodel_kernel,
            out_shape=jax.ShapeDtypeStruct((1, Bp), jnp.float32),
            grid_spec=pltpu.PrefetchScalarGridSpec(
                num_scalar_prefetch=1,
                grid=grid,
                in_specs=in_specs,
                out_specs=pl.BlockSpec((1, tile_b), lambda i, b2r: (0, i)),
            ),
            **extra,
        )(b2_sm, xn_t, w1t, bw, noise2)

    try:
        out_row = call(True)
    except Exception:
        # Graceful degradation: older jax without BlockSpec.pipeline_mode /
        # Buffered(1) — rerun with default (double-buffered) constants.
        out_row = call(False)

    # .view(-1) in the PyTorch module; drop padded batch lanes.
    return out_row[0, :B]


def init_params(key, in_size, hidden_size):
    """Parameter init mirroring PyTorch defaults (shapes / BN init)."""
    k1, k2, k3, k4 = jax.random.split(key, 4)
    gamma = jnp.ones((in_size,), jnp.float32)     # BatchNorm1d.weight
    beta = jnp.zeros((in_size,), jnp.float32)     # BatchNorm1d.bias
    lim1 = 1.0 / (in_size ** 0.5)
    w1 = jax.random.uniform(k1, (in_size, hidden_size), jnp.float32, -lim1, lim1)
    b1 = jax.random.uniform(k2, (hidden_size,), jnp.float32, -lim1, lim1)
    lim2 = 1.0 / (hidden_size ** 0.5)
    w2 = jax.random.uniform(k3, (hidden_size,), jnp.float32, -lim2, lim2)
    b2 = jax.random.uniform(k4, (1,), jnp.float32, -lim2, lim2)
    return gamma, beta, w1, b1, w2, b2


if __name__ == "__main__":
    B, in_size, hidden_size = 8, 32, 32

    key = jax.random.PRNGKey(0)
    kx, kp = jax.random.split(key)

    x = jax.random.normal(kx, (B, in_size), jnp.float32)
    gamma, beta, w1, b1, w2, b2 = init_params(kp, in_size, hidden_size)

    out = zmodel_forward(x, gamma, beta, w1, b1, w2, b2, seed=0)
    out = jax.block_until_ready(out)

    assert out.shape == (B,), out.shape
    assert bool(jnp.all(out >= 0.0))   # ReLU output is non-negative
    print("KERNEL_OK")
</pallas_src>

<mosaic_0001>
module attributes {stable_mosaic.version = 11 : i64} {
  func.func @zmodel_kernel(%arg0: i32, %arg1: memref<1xf32, #tpu.memory_space<smem>>, %arg2: memref<32x128xbf16, #tpu.memory_space<vmem>>, %arg3: memref<32x32xbf16, #tpu.memory_space<vmem>>, %arg4: memref<32x2xf32, #tpu.memory_space<vmem>>, %arg5: memref<32x128xbf16, #tpu.memory_space<vmem>>, %arg6: memref<1x128xf32, #tpu.memory_space<vmem>>) attributes {dimension_semantics = [#tpu.dimension_semantics<parallel>], iteration_bounds = array<i64: 1>, scalar_prefetch = 1 : i64, scratch_operands = 0 : i64, tpu.core_type = #tpu.core_type<tc>, window_params = [{transform_indices = @transform_0, window_bounds = array<i64: 32, 128>}, {pipeline_mode = #tpu.pipeline_mode<synchronous>, transform_indices = @transform_1, window_bounds = array<i64: 32, 32>}, {pipeline_mode = #tpu.pipeline_mode<synchronous>, transform_indices = @transform_2, window_bounds = array<i64: 32, 2>}, {transform_indices = @transform_3, window_bounds = array<i64: 32, 128>}, {transform_indices = @transform_4, window_bounds = array<i64: 1, 128>}]} {
    %c0 = arith.constant 0 : index
    %c0_0 = arith.constant 0 : index
    %0 = vector.load %arg3[%c0, %c0_0] : memref<32x32xbf16, #tpu.memory_space<vmem>>, vector<32x32xbf16>
    %c0_1 = arith.constant 0 : index
    %c0_2 = arith.constant 0 : index
    %1 = vector.load %arg2[%c0_1, %c0_2] : memref<32x128xbf16, #tpu.memory_space<vmem>>, vector<32x128xbf16>
    %cst = arith.constant dense<0.000000e+00> : vector<32x128xf32>
    %2 = tpu.matmul %0, %1, %cst {dimension_numbers = #tpu.dot_dimension_numbers<[1], [0], [0], [1], [0, 0, 1, 1], [], []>} : vector<32x32xbf16>, vector<32x128xbf16>, vector<32x128xf32> -> vector<32x128xf32>
    %c0_3 = arith.constant 0 : index
    %c0_4 = arith.constant 0 : index
    %3 = vector.load %arg4[%c0_3, %c0_4] : memref<32x2xf32, #tpu.memory_space<vmem>>, vector<32x2xf32>
    %4 = vector.extract_strided_slice %3 {offsets = [0, 0], sizes = [32, 1], strides = [1, 1]} : vector<32x2xf32> to vector<32x1xf32>
    %5 = vector.broadcast %4 : vector<32x1xf32> to vector<32x128xf32>
    %6 = arith.addf %2, %5 : vector<32x128xf32>
    %7 = math.tanh %6 : vector<32x128xf32>
    %c0_5 = arith.constant 0 : index
    %c0_6 = arith.constant 0 : index
    %8 = vector.load %arg5[%c0_5, %c0_6] : memref<32x128xbf16, #tpu.memory_space<vmem>>, vector<32x128xbf16>
    %9 = arith.extf %8 : vector<32x128xbf16> to vector<32x128xf32>
    %10 = arith.addf %7, %9 : vector<32x128xf32>
    %11 = vector.extract_strided_slice %3 {offsets = [0, 1], sizes = [32, 1], strides = [1, 1]} : vector<32x2xf32> to vector<32x1xf32>
    %12 = vector.broadcast %11 : vector<32x1xf32> to vector<32x128xf32>
    %13 = arith.mulf %10, %12 : vector<32x128xf32>
    %cst_7 = arith.constant dense<0.000000e+00> : vector<128xf32>
    %14 = vector.multi_reduction <add>, %13, %cst_7 [0] : vector<32x128xf32> to vector<128xf32>
    %15 = vector.shape_cast %14 : vector<128xf32> to vector<1x128xf32>
    %c0_8 = arith.constant 0 : index
    %16 = memref.load %arg1[%c0_8] : memref<1xf32, #tpu.memory_space<smem>>
    %17 = vector.broadcast %16 : f32 to vector<1x128xf32>
    %18 = arith.addf %15, %17 : vector<1x128xf32>
    %cst_9 = arith.constant 0.000000e+00 : f32
    %19 = vector.broadcast %cst_9 : f32 to vector<1x128xf32>
    %20 = arith.maximumf %18, %19 : vector<1x128xf32>
    %c0_10 = arith.constant 0 : index
    %c0_11 = arith.constant 0 : index
    %21 = vector.load %arg6[%c0_10, %c0_11] : memref<1x128xf32, #tpu.memory_space<vmem>>, vector<1x128xf32>
    tpu.vector_store %arg6[%c0_10, %c0_11], %20 {strides = array<i32>} : memref<1x128xf32, #tpu.memory_space<vmem>>, vector<1x128xf32>,
    return
  }
  func.func @transform_0(%arg0: i32, %arg1: memref<1xf32, #tpu.memory_space<smem>>) -> (i32, i32) {
    %c0_i32 = arith.constant 0 : i32
    %c0_i32_0 = arith.constant 0 : i32
    return %c0_i32, %arg0 : i32, i32
  }
  func.func @transform_1(%arg0: i32, %arg1: memref<1xf32, #tpu.memory_space<smem>>) -> (i32, i32) {
    %c0_i32 = arith.constant 0 : i32
    %c0_i32_0 = arith.constant 0 : i32
    %c0_i32_1 = arith.constant 0 : i32
    return %c0_i32, %c0_i32_0 : i32, i32
  }
  func.func @transform_2(%arg0: i32, %arg1: memref<1xf32, #tpu.memory_space<smem>>) -> (i32, i32) {
    %c0_i32 = arith.constant 0 : i32
    %c0_i32_0 = arith.constant 0 : i32
    %c0_i32_1 = arith.constant 0 : i32
    return %c0_i32, %c0_i32_0 : i32, i32
  }
  func.func @transform_3(%arg0: i32, %arg1: memref<1xf32, #tpu.memory_space<smem>>) -> (i32, i32) {
    %c0_i32 = arith.constant 0 : i32
    %c0_i32_0 = arith.constant 0 : i32
    return %c0_i32, %arg0 : i32, i32
  }
  func.func @transform_4(%arg0: i32, %arg1: memref<1xf32, #tpu.memory_space<smem>>) -> (i32, i32) {
    %c0_i32 = arith.constant 0 : i32
    %c0_i32_0 = arith.constant 0 : i32
    return %c0_i32, %arg0 : i32, i32
  }
}

module attributes {stable_mosaic.version = 11 : i64} {
  func.func @zmodel_kernel(%arg0: i32, %arg1: memref<1xf32, #tpu.memory_space<smem>>, %arg2: memref<32x128xbf16, #tpu.memory_space<vmem>>, %arg3: memref<32x32xbf16, #tpu.memory_space<vmem>>, %arg4: memref<32x2xf32, #tpu.memory_space<vmem>>, %arg5: memref<32x128xbf16, #tpu.memory_space<vmem>>, %arg6: memref<1x128xf32, #tpu.memory_space<vmem>>) attributes {dimension_semantics = [#tpu.dimension_semantics<parallel>], iteration_bounds = array<i64: 1>, scalar_prefetch = 1 : i64, scratch_operands = 0 : i64, tpu.core_type = #tpu.core_type<tc>, window_params = [{transform_indices = @transform_0, window_bounds = array<i64: 32, 128>}, {pipeline_mode = #tpu.pipeline_mode<synchronous>, transform_indices = @transform_1, window_bounds = array<i64: 32, 32>}, {pipeline_mode = #tpu.pipeline_mode<synchronous>, transform_indices = @transform_2, window_bounds = array<i64: 32, 2>}, {transform_indices = @transform_3, window_bounds = array<i64: 32, 128>}, {transform_indices = @transform_4, window_bounds = array<i64: 1, 128>}]} {
    %c0 = arith.constant 0 : index
    %c0_0 = arith.constant 0 : index
    %0 = vector.load %arg3[%c0, %c0_0] : memref<32x32xbf16, #tpu.memory_space<vmem>>, vector<32x32xbf16>
    %c0_1 = arith.constant 0 : index
    %c0_2 = arith.constant 0 : index
    %1 = vector.load %arg2[%c0_1, %c0_2] : memref<32x128xbf16, #tpu.memory_space<vmem>>, vector<32x128xbf16>
    %cst = arith.constant dense<0.000000e+00> : vector<32x128xf32>
    %2 = tpu.matmul %0, %1, %cst {dimension_numbers = #tpu.dot_dimension_numbers<[1], [0], [0], [1], [0, 0, 1, 1], [], []>} : vector<32x32xbf16>, vector<32x128xbf16>, vector<32x128xf32> -> vector<32x128xf32>
    %c0_3 = arith.constant 0 : index
    %c0_4 = arith.constant 0 : index
    %3 = vector.load %arg4[%c0_3, %c0_4] : memref<32x2xf32, #tpu.memory_space<vmem>>, vector<32x2xf32>
    %4 = vector.extract_strided_slice %3 {offsets = [0, 0], sizes = [32, 1], strides = [1, 1]} : vector<32x2xf32> to vector<32x1xf32>
    %5 = vector.broadcast %4 : vector<32x1xf32> to vector<32x128xf32>
    %6 = arith.addf %2, %5 : vector<32x128xf32>
    %7 = math.tanh %6 : vector<32x128xf32>
    %c0_5 = arith.constant 0 : index
    %c0_6 = arith.constant 0 : index
    %8 = vector.load %arg5[%c0_5, %c0_6] : memref<32x128xbf16, #tpu.memory_space<vmem>>, vector<32x128xbf16>
    %9 = arith.extf %8 : vector<32x128xbf16> to vector<32x128xf32>
    %10 = arith.addf %7, %9 : vector<32x128xf32>
    %11 = vector.extract_strided_slice %3 {offsets = [0, 1], sizes = [32, 1], strides = [1, 1]} : vector<32x2xf32> to vector<32x1xf32>
    %12 = vector.broadcast %11 : vector<32x1xf32> to vector<32x128xf32>
    %13 = arith.mulf %10, %12 : vector<32x128xf32>
    %cst_7 = arith.constant dense<0.000000e+00> : vector<128xf32>
    %14 = vector.multi_reduction <add>, %13, %cst_7 [0] : vector<32x128xf32> to vector<128xf32>
    %15 = vector.shape_cast %14 : vector<128xf32> to vector<1x128xf32>
    %c0_8 = arith.constant 0 : index
    %16 = memref.load %arg1[%c0_8] : memref<1xf32, #tpu.memory_space<smem>>
    %17 = vector.broadcast %16 : f32 to vector<1x128xf32>
    %18 = arith.addf %15, %17 : vector<1x128xf32>
    %cst_9 = arith.constant 0.000000e+00 : f32
    %19 = vector.broadcast %cst_9 : f32 to vector<1x128xf32>
    %20 = arith.maximumf %18, %19 : vector<1x128xf32>
    %c0_10 = arith.constant 0 : index
    %c0_11 = arith.constant 0 : index
    %21 = vector.load %arg6[%c0_10, %c0_11] : memref<1x128xf32, #tpu.memory_space<vmem>>, vector<1x128xf32>
    tpu.vector_store %arg6[%c0_10, %c0_11], %20 {strides = array<i32>} : memref<1x128xf32, #tpu.memory_space<vmem>>, vector<1x128xf32>,
    return
  }
  func.func @transform_0(%arg0: i32, %arg1: memref<1xf32, #tpu.memory_space<smem>>) -> (i32, i32) {
    %c0_i32 = arith.constant 0 : i32
    %c0_i32_0 = arith.constant 0 : i32
    return %c0_i32, %arg0 : i32, i32
  }
  func.func @transform_1(%arg0: i32, %arg1: memref<1xf32, #tpu.memory_space<smem>>) -> (i32, i32) {
    %c0_i32 = arith.constant 0 : i32
    %c0_i32_0 = arith.constant 0 : i32
    %c0_i32_1 = arith.constant 0 : i32
    return %c0_i32, %c0_i32_0 : i32, i32
  }
  func.func @transform_2(%arg0: i32, %arg1: memref<1xf32, #tpu.memory_space<smem>>) -> (i32, i32) {
    %c0_i32 = arith.constant 0 : i32
    %c0_i32_0 = arith.constant 0 : i32
    %c0_i32_1 = arith.constant 0 : i32
    return %c0_i32, %c0_i32_0 : i32, i32
  }
  func.func @transform_3(%arg0: i32, %arg1: memref<1xf32, #tpu.memory_space<smem>>) -> (i32, i32) {
    %c0_i32 = arith.constant 0 : i32
    %c0_i32_0 = arith.constant 0 : i32
    return %c0_i32, %arg0 : i32, i32
  }
  func.func @transform_4(%arg0: i32, %arg1: memref<1xf32, #tpu.memory_space<smem>>) -> (i32, i32) {
    %c0_i32 = arith.constant 0 : i32
    %c0_i32_0 = arith.constant 0 : i32
    return %c0_i32, %arg0 : i32, i32
  }
}

</mosaic_0001>

<bundles_post_ra>
// kernel: tpu_custom_call.1
= control target key start
LH: loop header
LB: loop body
LE: loop exit
PB: predicated region body
PF: predicated region fallthrough
CT: control target
= control target key end

     0   :  { %11 = vsyncpa [#allocation5], 0  ;;  %s374_s0 = inlined_call_operand.<no memory space> [shape: f32[1], index: 0, kind: input, shape index: {}]   ;;  %s375_s1 = inlined_call_operand.vmem [shape: bf16[32,128], index: 1, kind: input, shape index: {}]   ;;  %s376_s2 = inlined_call_operand.vmem [shape: bf16[32,32], index: 2, kind: input, shape index: {}]   ;;  %s377_s3 = inlined_call_operand.vmem [shape: f32[32,2], index: 3, kind: input, shape index: {}]   ;;  %s378_s4 = inlined_call_operand.hbm [shape: bf16[32,128], index: 4, kind: input, shape index: {}]   ;;  %s379_s5 = inlined_call_operand.hbm [shape: f32[1,128], index: 5, kind: output, shape index: {}]  }
   0x1   :  { %12 = vsyncpa [#allocation6], 0  ;;  %s303_s18 = smov [#allocation4]  }
   0x2   :  { %s24_s19 = sshll.u32 %s303_s18, 4  ;;  %s25_s19 = int_to_ptr.vmem [resolvable:$true] %s24_s19 }
   0x3   :  { %s267_s20 = scalar_lea.vmem %s25_s19, 256  ;;  %p272_p1 = scmp.lt.s32.totalorder %s25_s19, %s25_s19 }
   0x4   :  { %p268_p0 = scmp.ne.s32.totalorder %s25_s19, %s267_s20  ;;  %p273_p2 = scmp.lt.s32.totalorder %s267_s20, %s267_s20 }
   0x6   :  { %p274_p3 = por %p273_p2, %p272_p1 }
   0x8   :  { %p275_p4 = pnand %p274_p3, %p268_p0 }
   0xa   :  { %278 = shalt.err (!%p275_p4)
}
   0xb   :  { %s304_s21 = smov 64   ;;  %s305_s22 = smov 4  }
   0xc   :  { %30 = dma.hbm_to_vmem [thread:$0]  %s378_s4, 256, %s25_s19, [#allocation5], %s304_s21, %s304_s21, %s305_s22  }
   0xd   :  { %299 = dma.done.wait [#allocation5], 256  }
   0xe   :  { %300 = vsyncadd [#allocation5], 4294967040  ;;  %v306_v0 = vmov 0   ;;  %v247_v1 = vld [vmem:[%s375_s1 + $0x8] sm:$0xff]   ;;  %v248_v2 = vld [vmem:[%s375_s1] sm:$0xff]   ;;  %vm89_vm0 = vcmask 261120   ;;  %v191_v52 = vstv %s374_s0 }
   0xf   :  { %243 = vset.pattern.permute.xlu0 %v306_v0  ;;  %244 = vset.pattern.permute.xlu1 %v306_v0  ;;  %v249_v3 = vld [vmem:[%s376_s2] sm:$0xff]   ;;  %v45_v5 = vld [vmem:[%s377_s3 + $0x10] sm:$0xff]  ;;  %v250_v6 = vld [vmem:[%s376_s2 + $0x8] sm:$0xff]   ;;  %v307_v9 = vmov 1   ;;  %s308_s14 = smov [#allocation7]  }
  0x10   :  { %229 = vmatprep.subr.bf16.mxu0 %v247_v1  ;;  %233 = vmatprep.mubr.msk.bf16.mxu0 %vm89_vm0, %v249_v3  ;;  %v43_v4 = vld [vmem:[%s377_s3] sm:$0xff]  ;;  %v44_v7 = vld [vmem:[%s377_s3 + $0x8] sm:$0xff]  ;;  %v46_v8 = vld [vmem:[%s377_s3 + $0x18] sm:$0xff]  ;;  %s201_s15 = sshll.u32 %s308_s14, 4  ;;  %s202_s15 = int_to_ptr.vmem [resolvable:$true] %s201_s15 }
  0x11   :  { %230 = vmatpush3.bf16.msra.mxu0 %v247_v1  ;;  %49 = vperm.xlu0 %243, %v43_v4   ;;  %v217_v22 = vld [vmem:[#allocation4] sm:$0xff]   ;;  %v224_v23 = vld [vmem:[#allocation4 + $0x8] sm:$0xff]   ;;  %s279_s16 = scalar_lea.vmem %s202_s15, 16  ;;  %s283_s17 = scalar_lea.vmem %s202_s15, 32 }
  0x12   :  { %231 = vmatprep.subr.bf16.mxu0 %v248_v2  ;;  %59 = vperm.xlu1 %244, %v45_v5   ;;  %v218_v24 = vunpack.c.l.bf16 %v217_v22  ;;  %v219_v27 = vunpack.c.h.bf16 %v217_v22  ;;  %v222_v28 = vunpack.c.l.bf16 %v224_v23  ;;  %v223_v33 = vunpack.c.h.bf16 %v224_v23  ;;  %p280_p5 = scmp.ne.s32.totalorder %s202_s15, %s279_s16  ;;  %p284_p6 = scmp.lt.s32.totalorder %s202_s15, %s202_s15 }
  0x13   :  { %p285_p7 = scmp.lt.s32.totalorder %s283_s17, %s279_s16 }
  0x15   :  { %232 = vmatpush3.bf16.msra.mxu0 %v248_v2  ;;  %54 = vperm.xlu0 %243, %v44_v7   ;;  %p286_p8 = por %p285_p7, %p284_p6 }
  0x16   :  { %64 = vperm.xlu1 %244, %v46_v8  }
  0x17   :  { %p287_p9 = pnand %p286_p8, %p280_p5 }
  0x18   :  { %234 = vmatmul.mubr.msk.bf16.vlgmr.msra.gmra.mxu0 %vm89_vm0, %v250_v6 }
  0x19   :  { %245 = vset.pattern.permute.xlu0 %v307_v9 }
  0x1a   :  { %246 = vset.pattern.permute.xlu1 %v307_v9  ;;  %162 = vperm.xlu0 %245, %v43_v4  }
  0x1b   :  { %166 = vperm.xlu1 %246, %v44_v7  }
  0x1e   :  { %174 = vperm.xlu0 %245, %v46_v8  }
  0x1f   :  { %170 = vperm.xlu1 %246, %v45_v5  }
  0x8c   :  { %v50_v11 = vpop.permute.xlu0 %49 }
  0x8d   :  { %v60_v10 = vpop.permute.xlu1 %59 }
  0x90   :  { %v55_v19 = vpop.permute.xlu0 %54 }
  0x91   :  { %v65_v14 = vpop.permute.xlu1 %64 }
  0x95   :  { %v163_v30 = vpop.permute.xlu0 %162 }
  0x96   :  { %v167_v26 = vpop.permute.xlu1 %166 }
  0x99   :  { %v175_v41 = vpop.permute.xlu0 %174 }
  0x9a   :  { %v171_v37 = vpop.permute.xlu1 %170 }
  0xd8   :  { %v235_v12 = vpop.f32.mrf.mxu0 }
  0xd9   :  { %v139_v15 = vadd.f32 %v235_v12, %v60_v10 }
  0xda   :  { %v130_v13 = vpop.f32.mrf.mxu0 }
  0xdb   :  { %v131_v16 = vadd.f32 %v130_v13, %v50_v11 }
  0xdc   :  { %v236_v17 = vpop.f32.mrf.mxu0 }
  0xdd   :  { %251 = vtanh.f32 %v131_v16  ;;  %v142_v18 = vadd.f32 %v236_v17, %v65_v14 }
  0xde   :  { %v133_v20 = vpop.f32.mrf.mxu0  ;;  %253 = vtanh.f32 %v139_v15 }
  0xdf   :  { %v134_v21 = vadd.f32 %v133_v20, %v55_v19  ;;  %255 = vtanh.f32 %v142_v18 }
  0xe1   :  { %257 = vtanh.f32 %v134_v21 }
  0xea   :  { %v252_v25 = vpop.eup %251 }
  0xeb   :  { %v254_v29 = vpop.eup %253  ;;  %v157_v32 = vadd.f32 %v252_v25, %v218_v24 }
  0xec   :  { %v256_v31 = vpop.eup %255  ;;  %v159_v36 = vadd.f32 %v254_v29, %v222_v28 }
  0xed   :  { %v177_v39 = vmul.f32 %v163_v30, %v157_v32  ;;  %v160_v40 = vadd.f32 %v256_v31, %v223_v33 }
  0xee   :  { %v258_v34 = vpop.eup %257  ;;  %v179_v42 = vmul.f32 %v171_v37, %v159_v36 }
  0xef   :  { %v158_v35 = vadd.f32 %v258_v34, %v219_v27  ;;  %v180_v44 = vmul.f32 %v175_v41, %v160_v40 }
  0xf1   :  { %v178_v38 = vmul.f32 %v167_v26, %v158_v35 }
  0xf3   :  { %v181_v43 = vadd.f32 %v178_v38, %v177_v39 }
  0xf5   :  { %v182_v45 = vadd.f32 %v181_v43, %v179_v42 }
  0xf7   :  { %v183_v46 = vadd.f32 %v182_v45, %v180_v44 }
  0xf9   :  { %v184_v47 = vrot.slane %v183_v46, 4 }
  0xfb   :  { %v185_v48 = vadd.f32 %v184_v47, %v183_v46 }
  0xfd   :  { %v186_v49 = vrot.slane %v185_v48, 2 }
  0xff   :  { %v187_v50 = vadd.f32 %v186_v49, %v185_v48 }
 0x101   :  { %v188_v51 = vrot.slane %v187_v50, 1 }
 0x103   :  { %v189_v53 = vadd.f32 %v188_v51, %v187_v50 }
 0x105   :  { %v192_v54 = vadd.f32 %v191_v52, %v189_v53 }
 0x107   :  { %v193_v55 = vmax.f32 %v192_v54, 0.0 }
 0x109   :  { %194 = vst [vmem:[#allocation7] sm:$0x1] %v193_v55 }
 0x10a   :  { %290 = shalt.err (!%p287_p9)
}
 0x10b   :  { %204 = dma.vmem_to_hbm [thread:$0]  %s202_s15, 16, %s379_s5, [#allocation6]  }
 0x10c   :  { %301 = dma.done.wait [#allocation6], 16  }
 0x10d   :  { %302 = vsyncadd [#allocation6], 4294967280 }
 0x10e   :  { %208 = vsyncpa [#allocation5], 1 }
 0x10f   :  { %209 = vsyncpa [#allocation6], 1 }

// kernel: tpu_custom_call.1
= control target key start
LH: loop header
LB: loop body
LE: loop exit
PB: predicated region body
PF: predicated region fallthrough
CT: control target
= control target key end

     0   :  { %11 = vsyncpa [#allocation5], 0  ;;  %s374_s0 = inlined_call_operand.<no memory space> [shape: f32[1], index: 0, kind: input, shape index: {}]   ;;  %s375_s1 = inlined_call_operand.vmem [shape: bf16[32,128], index: 1, kind: input, shape index: {}]   ;;  %s376_s2 = inlined_call_operand.vmem [shape: bf16[32,32], index: 2, kind: input, shape index: {}]   ;;  %s377_s3 = inlined_call_operand.vmem [shape: f32[32,2], index: 3, kind: input, shape index: {}]   ;;  %s378_s4 = inlined_call_operand.hbm [shape: bf16[32,128], index: 4, kind: input, shape index: {}]   ;;  %s379_s5 = inlined_call_operand.hbm [shape: f32[1,128], index: 5, kind: output, shape index: {}]  }
   0x1   :  { %12 = vsyncpa [#allocation6], 0  ;;  %s303_s18 = smov [#allocation4]  }
   0x2   :  { %s24_s19 = sshll.u32 %s303_s18, 4  ;;  %s25_s19 = int_to_ptr.vmem [resolvable:$true] %s24_s19 }
   0x3   :  { %s267_s20 = scalar_lea.vmem %s25_s19, 256  ;;  %p272_p1 = scmp.lt.s32.totalorder %s25_s19, %s25_s19 }
   0x4   :  { %p268_p0 = scmp.ne.s32.totalorder %s25_s19, %s267_s20  ;;  %p273_p2 = scmp.lt.s32.totalorder %s267_s20, %s267_s20 }
   0x6   :  { %p274_p3 = por %p273_p2, %p272_p1 }
   0x8   :  { %p275_p4 = pnand %p274_p3, %p268_p0 }
   0xa   :  { %278 = shalt.err (!%p275_p4)
}
   0xb   :  { %s304_s21 = smov 64   ;;  %s305_s22 = smov 4  }
   0xc   :  { %30 = dma.hbm_to_vmem [thread:$0]  %s378_s4, 256, %s25_s19, [#allocation5], %s304_s21, %s304_s21, %s305_s22  }
   0xd   :  { %299 = dma.done.wait [#allocation5], 256  }
   0xe   :  { %300 = vsyncadd [#allocation5], 4294967040  ;;  %v306_v0 = vmov 0   ;;  %v247_v1 = vld [vmem:[%s375_s1 + $0x8] sm:$0xff]   ;;  %v248_v2 = vld [vmem:[%s375_s1] sm:$0xff]   ;;  %vm89_vm0 = vcmask 261120   ;;  %v191_v52 = vstv %s374_s0 }
   0xf   :  { %243 = vset.pattern.permute.xlu0 %v306_v0  ;;  %244 = vset.pattern.permute.xlu1 %v306_v0  ;;  %v249_v3 = vld [vmem:[%s376_s2] sm:$0xff]   ;;  %v45_v5 = vld [vmem:[%s377_s3 + $0x10] sm:$0xff]  ;;  %v250_v6 = vld [vmem:[%s376_s2 + $0x8] sm:$0xff]   ;;  %v307_v9 = vmov 1   ;;  %s308_s14 = smov [#allocation7]  }
  0x10   :  { %229 = vmatprep.subr.bf16.mxu0 %v247_v1  ;;  %233 = vmatprep.mubr.msk.bf16.mxu0 %vm89_vm0, %v249_v3  ;;  %v43_v4 = vld [vmem:[%s377_s3] sm:$0xff]  ;;  %v44_v7 = vld [vmem:[%s377_s3 + $0x8] sm:$0xff]  ;;  %v46_v8 = vld [vmem:[%s377_s3 + $0x18] sm:$0xff]  ;;  %s201_s15 = sshll.u32 %s308_s14, 4  ;;  %s202_s15 = int_to_ptr.vmem [resolvable:$true] %s201_s15 }
  0x11   :  { %230 = vmatpush3.bf16.msra.mxu0 %v247_v1  ;;  %49 = vperm.xlu0 %243, %v43_v4   ;;  %v217_v22 = vld [vmem:[#allocation4] sm:$0xff]   ;;  %v224_v23 = vld [vmem:[#allocation4 + $0x8] sm:$0xff]   ;;  %s279_s16 = scalar_lea.vmem %s202_s15, 16  ;;  %s283_s17 = scalar_lea.vmem %s202_s15, 32 }
  0x12   :  { %231 = vmatprep.subr.bf16.mxu0 %v248_v2  ;;  %59 = vperm.xlu1 %244, %v45_v5   ;;  %v218_v24 = vunpack.c.l.bf16 %v217_v22  ;;  %v219_v27 = vunpack.c.h.bf16 %v217_v22  ;;  %v222_v28 = vunpack.c.l.bf16 %v224_v23  ;;  %v223_v33 = vunpack.c.h.bf16 %v224_v23  ;;  %p280_p5 = scmp.ne.s32.totalorder %s202_s15, %s279_s16  ;;  %p284_p6 = scmp.lt.s32.totalorder %s202_s15, %s202_s15 }
  0x13   :  { %p285_p7 = scmp.lt.s32.totalorder %s283_s17, %s279_s16 }
  0x15   :  { %232 = vmatpush3.bf16.msra.mxu0 %v248_v2  ;;  %54 = vperm.xlu0 %243, %v44_v7   ;;  %p286_p8 = por %p285_p7, %p284_p6 }
  0x16   :  { %64 = vperm.xlu1 %244, %v46_v8  }
  0x17   :  { %p287_p9 = pnand %p286_p8, %p280_p5 }
  0x18   :  { %234 = vmatmul.mubr.msk.bf16.vlgmr.msra.gmra.mxu0 %vm89_vm0, %v250_v6 }
  0x19   :  { %245 = vset.pattern.permute.xlu0 %v307_v9 }
  0x1a   :  { %246 = vset.pattern.permute.xlu1 %v307_v9  ;;  %162 = vperm.xlu0 %245, %v43_v4  }
  0x1b   :  { %166 = vperm.xlu1 %246, %v44_v7  }
  0x1e   :  { %174 = vperm.xlu0 %245, %v46_v8  }
  0x1f   :  { %170 = vperm.xlu1 %246, %v45_v5  }
  0x8c   :  { %v50_v11 = vpop.permute.xlu0 %49 }
  0x8d   :  { %v60_v10 = vpop.permute.xlu1 %59 }
  0x90   :  { %v55_v19 = vpop.permute.xlu0 %54 }
  0x91   :  { %v65_v14 = vpop.permute.xlu1 %64 }
  0x95   :  { %v163_v30 = vpop.permute.xlu0 %162 }
  0x96   :  { %v167_v26 = vpop.permute.xlu1 %166 }
  0x99   :  { %v175_v41 = vpop.permute.xlu0 %174 }
  0x9a   :  { %v171_v37 = vpop.permute.xlu1 %170 }
  0xd8   :  { %v235_v12 = vpop.f32.mrf.mxu0 }
  0xd9   :  { %v139_v15 = vadd.f32 %v235_v12, %v60_v10 }
  0xda   :  { %v130_v13 = vpop.f32.mrf.mxu0 }
  0xdb   :  { %v131_v16 = vadd.f32 %v130_v13, %v50_v11 }
  0xdc   :  { %v236_v17 = vpop.f32.mrf.mxu0 }
  0xdd   :  { %251 = vtanh.f32 %v131_v16  ;;  %v142_v18 = vadd.f32 %v236_v17, %v65_v14 }
  0xde   :  { %v133_v20 = vpop.f32.mrf.mxu0  ;;  %253 = vtanh.f32 %v139_v15 }
  0xdf   :  { %v134_v21 = vadd.f32 %v133_v20, %v55_v19  ;;  %255 = vtanh.f32 %v142_v18 }
  0xe1   :  { %257 = vtanh.f32 %v134_v21 }
  0xea   :  { %v252_v25 = vpop.eup %251 }
  0xeb   :  { %v254_v29 = vpop.eup %253  ;;  %v157_v32 = vadd.f32 %v252_v25, %v218_v24 }
  0xec   :  { %v256_v31 = vpop.eup %255  ;;  %v159_v36 = vadd.f32 %v254_v29, %v222_v28 }
  0xed   :  { %v177_v39 = vmul.f32 %v163_v30, %v157_v32  ;;  %v160_v40 = vadd.f32 %v256_v31, %v223_v33 }
  0xee   :  { %v258_v34 = vpop.eup %257  ;;  %v179_v42 = vmul.f32 %v171_v37, %v159_v36 }
  0xef   :  { %v158_v35 = vadd.f32 %v258_v34, %v219_v27  ;;  %v180_v44 = vmul.f32 %v175_v41, %v160_v40 }
  0xf1   :  { %v178_v38 = vmul.f32 %v167_v26, %v158_v35 }
  0xf3   :  { %v181_v43 = vadd.f32 %v178_v38, %v177_v39 }
  0xf5   :  { %v182_v45 = vadd.f32 %v181_v43, %v179_v42 }
  0xf7   :  { %v183_v46 = vadd.f32 %v182_v45, %v180_v44 }
  0xf9   :  { %v184_v47 = vrot.slane %v183_v46, 4 }
  0xfb   :  { %v185_v48 = vadd.f32 %v184_v47, %v183_v46 }
  0xfd   :  { %v186_v49 = vrot.slane %v185_v48, 2 }
  0xff   :  { %v187_v50 = vadd.f32 %v186_v49, %v185_v48 }
 0x101   :  { %v188_v51 = vrot.slane %v187_v50, 1 }
 0x103   :  { %v189_v53 = vadd.f32 %v188_v51, %v187_v50 }
 0x105   :  { %v192_v54 = vadd.f32 %v191_v52, %v189_v53 }
 0x107   :  { %v193_v55 = vmax.f32 %v192_v54, 0.0 }
 0x109   :  { %194 = vst [vmem:[#allocation7] sm:$0x1] %v193_v55 }
 0x10a   :  { %290 = shalt.err (!%p287_p9)
}
 0x10b   :  { %204 = dma.vmem_to_hbm [thread:$0]  %s202_s15, 16, %s379_s5, [#allocation6]  }
 0x10c   :  { %301 = dma.done.wait [#allocation6], 16  }
 0x10d   :  { %302 = vsyncadd [#allocation6], 4294967280 }
 0x10e   :  { %208 = vsyncpa [#allocation5], 1 }
 0x10f   :  { %209 = vsyncpa [#allocation6], 1 }

</bundles_post_ra>
